<compile_context>
chip_gen: v6e
topology: v6e:2x2x1
jax: 0.10.0
libtpu: 0.0.40
codegen_flags: <defaults>
</compile_context>

<pallas_src>
import math

import jax
import jax.numpy as jnp
from jax.experimental import pallas as pl
from jax.experimental.pallas import tpu as pltpu

# Small demo hyperparameters (consistent with the d2l transformer demo scale).
VOCAB = 64
D_MODEL = 32
BATCH = 2
SEQ = 8


def embeddings_kernel(ids_ref, lut_ref, out_ref):
    # ids_ref : SMEM int32[T]            (scalar-prefetched token ids)
    # lut_ref : VMEM f32[V, 1, D]        (embedding table; leading axis = vocab row)
    # out_ref : VMEM f32[T, D]
    tokens = out_ref.shape[0]                      # static
    d_model = lut_ref.shape[-1]                    # static
    scale = jnp.float32(math.sqrt(d_model))        # hoisted once, fused into each store
    for t in range(tokens):                        # static unroll: token count is tiny
        row = lut_ref[ids_ref[t]]                  # (1, D): dynamic leading-axis row read
        out_ref[pl.ds(t, 1), :] = row * scale


def embeddings(x_ids, lut):
    """x_ids: int (B, L) token ids; lut: (V, D) float32 embedding table."""
    B, L = x_ids.shape
    V, D = lut.shape
    T = B * L
    ids_flat = x_ids.reshape(T).astype(jnp.int32)
    # Leading 'row' axis so the in-kernel gather indexes a non-tiled axis (address math only).
    lut3 = lut.reshape(V, 1, D)
    # TODO(synk): for a production-size vocab that does not fit VMEM, keep the table in HBM
    # (memory_space=pl.ANY) and gather only the needed rows with manual pltpu.make_async_copy.
    out_flat = pl.pallas_call(
        embeddings_kernel,
        out_shape=jax.ShapeDtypeStruct((T, D), lut.dtype),
        grid_spec=pltpu.PrefetchScalarGridSpec(
            num_scalar_prefetch=1,
            grid=(1,),
            in_specs=[pl.BlockSpec((V, 1, D), lambda i, ids: (0, 0, 0))],
            out_specs=pl.BlockSpec((T, D), lambda i, ids: (0, 0)),
        ),
        compiler_params=pltpu.CompilerParams(
            dimension_semantics=("arbitrary",)),
    )(ids_flat, lut3)
    return out_flat.reshape(B, L, D)


def embeddings_ref(x_ids, lut):
    """Pure-JAX reference mirroring the PyTorch forward."""
    return lut[x_ids] * math.sqrt(lut.shape[-1])


if __name__ == "__main__":
    key = jax.random.PRNGKey(0)
    k_ids, k_lut = jax.random.split(key)
    x = jax.random.randint(k_ids, (BATCH, SEQ), 0, VOCAB, dtype=jnp.int32)
    lut = jax.random.normal(k_lut, (VOCAB, D_MODEL), jnp.float32)

    out = jax.jit(embeddings)(x, lut)
    jax.block_until_ready(out)

    ref = embeddings_ref(x, lut)
    assert out.shape == (BATCH, SEQ, D_MODEL)
    assert jnp.allclose(out, ref, atol=1e-6, rtol=1e-6)

    print("KERNEL_OK")
</pallas_src>

<mosaic_0001>
module attributes {stable_mosaic.version = 11 : i64} {
  func.func @embeddings_kernel(%arg0: i32, %arg1: memref<16xi32, #tpu.memory_space<smem>>, %arg2: memref<64x1x32xf32, #tpu.memory_space<vmem>>, %arg3: memref<16x32xf32, #tpu.memory_space<vmem>>) attributes {dimension_semantics = [#tpu.dimension_semantics<arbitrary>], iteration_bounds = array<i64: 1>, scalar_prefetch = 1 : i64, scratch_operands = 0 : i64, tpu.core_type = #tpu.core_type<tc>, window_params = [{pipeline_mode = #tpu.pipeline_mode<synchronous>, transform_indices = @transform_0, window_bounds = array<i64: 64, 1, 32>}, {pipeline_mode = #tpu.pipeline_mode<synchronous>, transform_indices = @transform_1, window_bounds = array<i64: 16, 32>}]} {
    %c0 = arith.constant 0 : index
    %0 = memref.load %arg1[%c0] : memref<16xi32, #tpu.memory_space<smem>>
    %1 = arith.index_cast %0 : i32 to index
    %c0_0 = arith.constant 0 : index
    %c0_1 = arith.constant 0 : index
    %2 = vector.load %arg2[%1, %c0_0, %c0_1] : memref<64x1x32xf32, #tpu.memory_space<vmem>>, vector<1x1x32xf32>
    %3 = vector.shape_cast %2 : vector<1x1x32xf32> to vector<1x32xf32>
    %cst = arith.constant 5.65685415 : f32
    %4 = vector.broadcast %cst : f32 to vector<1x32xf32>
    %5 = arith.mulf %3, %4 : vector<1x32xf32>
    %c0_2 = arith.constant 0 : index
    %c0_3 = arith.constant 0 : index
    %6 = vector.load %arg3[%c0_2, %c0_3] : memref<16x32xf32, #tpu.memory_space<vmem>>, vector<1x32xf32>
    tpu.vector_store %arg3[%c0_2, %c0_3], %5 {strides = array<i32>} : memref<16x32xf32, #tpu.memory_space<vmem>>, vector<1x32xf32>,
    %c1 = arith.constant 1 : index
    %7 = memref.load %arg1[%c1] : memref<16xi32, #tpu.memory_space<smem>>
    %8 = arith.index_cast %7 : i32 to index
    %c0_4 = arith.constant 0 : index
    %c0_5 = arith.constant 0 : index
    %9 = vector.load %arg2[%8, %c0_4, %c0_5] : memref<64x1x32xf32, #tpu.memory_space<vmem>>, vector<1x1x32xf32>
    %10 = vector.shape_cast %9 : vector<1x1x32xf32> to vector<1x32xf32>
    %cst_6 = arith.constant 5.65685415 : f32
    %11 = vector.broadcast %cst_6 : f32 to vector<1x32xf32>
    %12 = arith.mulf %10, %11 : vector<1x32xf32>
    %c1_7 = arith.constant 1 : index
    %c0_8 = arith.constant 0 : index
    %13 = vector.load %arg3[%c1_7, %c0_8] : memref<16x32xf32, #tpu.memory_space<vmem>>, vector<1x32xf32>
    tpu.vector_store %arg3[%c1_7, %c0_8], %12 {strides = array<i32>} : memref<16x32xf32, #tpu.memory_space<vmem>>, vector<1x32xf32>,
    %c2 = arith.constant 2 : index
    %14 = memref.load %arg1[%c2] : memref<16xi32, #tpu.memory_space<smem>>
    %15 = arith.index_cast %14 : i32 to index
    %c0_9 = arith.constant 0 : index
    %c0_10 = arith.constant 0 : index
    %16 = vector.load %arg2[%15, %c0_9, %c0_10] : memref<64x1x32xf32, #tpu.memory_space<vmem>>, vector<1x1x32xf32>
    %17 = vector.shape_cast %16 : vector<1x1x32xf32> to vector<1x32xf32>
    %cst_11 = arith.constant 5.65685415 : f32
    %18 = vector.broadcast %cst_11 : f32 to vector<1x32xf32>
    %19 = arith.mulf %17, %18 : vector<1x32xf32>
    %c2_12 = arith.constant 2 : index
    %c0_13 = arith.constant 0 : index
    %20 = vector.load %arg3[%c2_12, %c0_13] : memref<16x32xf32, #tpu.memory_space<vmem>>, vector<1x32xf32>
    tpu.vector_store %arg3[%c2_12, %c0_13], %19 {strides = array<i32>} : memref<16x32xf32, #tpu.memory_space<vmem>>, vector<1x32xf32>,
    %c3 = arith.constant 3 : index
    %21 = memref.load %arg1[%c3] : memref<16xi32, #tpu.memory_space<smem>>
    %22 = arith.index_cast %21 : i32 to index
    %c0_14 = arith.constant 0 : index
    %c0_15 = arith.constant 0 : index
    %23 = vector.load %arg2[%22, %c0_14, %c0_15] : memref<64x1x32xf32, #tpu.memory_space<vmem>>, vector<1x1x32xf32>
    %24 = vector.shape_cast %23 : vector<1x1x32xf32> to vector<1x32xf32>
    %cst_16 = arith.constant 5.65685415 : f32
    %25 = vector.broadcast %cst_16 : f32 to vector<1x32xf32>
    %26 = arith.mulf %24, %25 : vector<1x32xf32>
    %c3_17 = arith.constant 3 : index
    %c0_18 = arith.constant 0 : index
    %27 = vector.load %arg3[%c3_17, %c0_18] : memref<16x32xf32, #tpu.memory_space<vmem>>, vector<1x32xf32>
    tpu.vector_store %arg3[%c3_17, %c0_18], %26 {strides = array<i32>} : memref<16x32xf32, #tpu.memory_space<vmem>>, vector<1x32xf32>,
    %c4 = arith.constant 4 : index
    %28 = memref.load %arg1[%c4] : memref<16xi32, #tpu.memory_space<smem>>
    %29 = arith.index_cast %28 : i32 to index
    %c0_19 = arith.constant 0 : index
    %c0_20 = arith.constant 0 : index
    %30 = vector.load %arg2[%29, %c0_19, %c0_20] : memref<64x1x32xf32, #tpu.memory_space<vmem>>, vector<1x1x32xf32>
    %31 = vector.shape_cast %30 : vector<1x1x32xf32> to vector<1x32xf32>
    %cst_21 = arith.constant 5.65685415 : f32
    %32 = vector.broadcast %cst_21 : f32 to vector<1x32xf32>
    %33 = arith.mulf %31, %32 : vector<1x32xf32>
    %c4_22 = arith.constant 4 : index
    %c0_23 = arith.constant 0 : index
    %34 = vector.load %arg3[%c4_22, %c0_23] : memref<16x32xf32, #tpu.memory_space<vmem>>, vector<1x32xf32>
    tpu.vector_store %arg3[%c4_22, %c0_23], %33 {strides = array<i32>} : memref<16x32xf32, #tpu.memory_space<vmem>>, vector<1x32xf32>,
    %c5 = arith.constant 5 : index
    %35 = memref.load %arg1[%c5] : memref<16xi32, #tpu.memory_space<smem>>
    %36 = arith.index_cast %35 : i32 to index
    %c0_24 = arith.constant 0 : index
    %c0_25 = arith.constant 0 : index
    %37 = vector.load %arg2[%36, %c0_24, %c0_25] : memref<64x1x32xf32, #tpu.memory_space<vmem>>, vector<1x1x32xf32>
    %38 = vector.shape_cast %37 : vector<1x1x32xf32> to vector<1x32xf32>
    %cst_26 = arith.constant 5.65685415 : f32
    %39 = vector.broadcast %cst_26 : f32 to vector<1x32xf32>
    %40 = arith.mulf %38, %39 : vector<1x32xf32>
    %c5_27 = arith.constant 5 : index
    %c0_28 = arith.constant 0 : index
    %41 = vector.load %arg3[%c5_27, %c0_28] : memref<16x32xf32, #tpu.memory_space<vmem>>, vector<1x32xf32>
    tpu.vector_store %arg3[%c5_27, %c0_28], %40 {strides = array<i32>} : memref<16x32xf32, #tpu.memory_space<vmem>>, vector<1x32xf32>,
    %c6 = arith.constant 6 : index
    %42 = memref.load %arg1[%c6] : memref<16xi32, #tpu.memory_space<smem>>
    %43 = arith.index_cast %42 : i32 to index
    %c0_29 = arith.constant 0 : index
    %c0_30 = arith.constant 0 : index
    %44 = vector.load %arg2[%43, %c0_29, %c0_30] : memref<64x1x32xf32, #tpu.memory_space<vmem>>, vector<1x1x32xf32>
    %45 = vector.shape_cast %44 : vector<1x1x32xf32> to vector<1x32xf32>
    %cst_31 = arith.constant 5.65685415 : f32
    %46 = vector.broadcast %cst_31 : f32 to vector<1x32xf32>
    %47 = arith.mulf %45, %46 : vector<1x32xf32>
    %c6_32 = arith.constant 6 : index
    %c0_33 = arith.constant 0 : index
    %48 = vector.load %arg3[%c6_32, %c0_33] : memref<16x32xf32, #tpu.memory_space<vmem>>, vector<1x32xf32>
    tpu.vector_store %arg3[%c6_32, %c0_33], %47 {strides = array<i32>} : memref<16x32xf32, #tpu.memory_space<vmem>>, vector<1x32xf32>,
    %c7 = arith.constant 7 : index
    %49 = memref.load %arg1[%c7] : memref<16xi32, #tpu.memory_space<smem>>
    %50 = arith.index_cast %49 : i32 to index
    %c0_34 = arith.constant 0 : index
    %c0_35 = arith.constant 0 : index
    %51 = vector.load %arg2[%50, %c0_34, %c0_35] : memref<64x1x32xf32, #tpu.memory_space<vmem>>, vector<1x1x32xf32>
    %52 = vector.shape_cast %51 : vector<1x1x32xf32> to vector<1x32xf32>
    %cst_36 = arith.constant 5.65685415 : f32
    %53 = vector.broadcast %cst_36 : f32 to vector<1x32xf32>
    %54 = arith.mulf %52, %53 : vector<1x32xf32>
    %c7_37 = arith.constant 7 : index
    %c0_38 = arith.constant 0 : index
    %55 = vector.load %arg3[%c7_37, %c0_38] : memref<16x32xf32, #tpu.memory_space<vmem>>, vector<1x32xf32>
    tpu.vector_store %arg3[%c7_37, %c0_38], %54 {strides = array<i32>} : memref<16x32xf32, #tpu.memory_space<vmem>>, vector<1x32xf32>,
    %c8 = arith.constant 8 : index
    %56 = memref.load %arg1[%c8] : memref<16xi32, #tpu.memory_space<smem>>
    %57 = arith.index_cast %56 : i32 to index
    %c0_39 = arith.constant 0 : index
    %c0_40 = arith.constant 0 : index
    %58 = vector.load %arg2[%57, %c0_39, %c0_40] : memref<64x1x32xf32, #tpu.memory_space<vmem>>, vector<1x1x32xf32>
    %59 = vector.shape_cast %58 : vector<1x1x32xf32> to vector<1x32xf32>
    %cst_41 = arith.constant 5.65685415 : f32
    %60 = vector.broadcast %cst_41 : f32 to vector<1x32xf32>
    %61 = arith.mulf %59, %60 : vector<1x32xf32>
    %c8_42 = arith.constant 8 : index
    %c0_43 = arith.constant 0 : index
    %62 = vector.load %arg3[%c8_42, %c0_43] : memref<16x32xf32, #tpu.memory_space<vmem>>, vector<1x32xf32>
    tpu.vector_store %arg3[%c8_42, %c0_43], %61 {strides = array<i32>} : memref<16x32xf32, #tpu.memory_space<vmem>>, vector<1x32xf32>,
    %c9 = arith.constant 9 : index
    %63 = memref.load %arg1[%c9] : memref<16xi32, #tpu.memory_space<smem>>
    %64 = arith.index_cast %63 : i32 to index
    %c0_44 = arith.constant 0 : index
    %c0_45 = arith.constant 0 : index
    %65 = vector.load %arg2[%64, %c0_44, %c0_45] : memref<64x1x32xf32, #tpu.memory_space<vmem>>, vector<1x1x32xf32>
    %66 = vector.shape_cast %65 : vector<1x1x32xf32> to vector<1x32xf32>
    %cst_46 = arith.constant 5.65685415 : f32
    %67 = vector.broadcast %cst_46 : f32 to vector<1x32xf32>
    %68 = arith.mulf %66, %67 : vector<1x32xf32>
    %c9_47 = arith.constant 9 : index
    %c0_48 = arith.constant 0 : index
    %69 = vector.load %arg3[%c9_47, %c0_48] : memref<16x32xf32, #tpu.memory_space<vmem>>, vector<1x32xf32>
    tpu.vector_store %arg3[%c9_47, %c0_48], %68 {strides = array<i32>} : memref<16x32xf32, #tpu.memory_space<vmem>>, vector<1x32xf32>,
    %c10 = arith.constant 10 : index
    %70 = memref.load %arg1[%c10] : memref<16xi32, #tpu.memory_space<smem>>
    %71 = arith.index_cast %70 : i32 to index
    %c0_49 = arith.constant 0 : index
    %c0_50 = arith.constant 0 : index
    %72 = vector.load %arg2[%71, %c0_49, %c0_50] : memref<64x1x32xf32, #tpu.memory_space<vmem>>, vector<1x1x32xf32>
    %73 = vector.shape_cast %72 : vector<1x1x32xf32> to vector<1x32xf32>
    %cst_51 = arith.constant 5.65685415 : f32
    %74 = vector.broadcast %cst_51 : f32 to vector<1x32xf32>
    %75 = arith.mulf %73, %74 : vector<1x32xf32>
    %c10_52 = arith.constant 10 : index
    %c0_53 = arith.constant 0 : index
    %76 = vector.load %arg3[%c10_52, %c0_53] : memref<16x32xf32, #tpu.memory_space<vmem>>, vector<1x32xf32>
    tpu.vector_store %arg3[%c10_52, %c0_53], %75 {strides = array<i32>} : memref<16x32xf32, #tpu.memory_space<vmem>>, vector<1x32xf32>,
    %c11 = arith.constant 11 : index
    %77 = memref.load %arg1[%c11] : memref<16xi32, #tpu.memory_space<smem>>
    %78 = arith.index_cast %77 : i32 to index
    %c0_54 = arith.constant 0 : index
    %c0_55 = arith.constant 0 : index
    %79 = vector.load %arg2[%78, %c0_54, %c0_55] : memref<64x1x32xf32, #tpu.memory_space<vmem>>, vector<1x1x32xf32>
    %80 = vector.shape_cast %79 : vector<1x1x32xf32> to vector<1x32xf32>
    %cst_56 = arith.constant 5.65685415 : f32
    %81 = vector.broadcast %cst_56 : f32 to vector<1x32xf32>
    %82 = arith.mulf %80, %81 : vector<1x32xf32>
    %c11_57 = arith.constant 11 : index
    %c0_58 = arith.constant 0 : index
    %83 = vector.load %arg3[%c11_57, %c0_58] : memref<16x32xf32, #tpu.memory_space<vmem>>, vector<1x32xf32>
    tpu.vector_store %arg3[%c11_57, %c0_58], %82 {strides = array<i32>} : memref<16x32xf32, #tpu.memory_space<vmem>>, vector<1x32xf32>,
    %c12 = arith.constant 12 : index
    %84 = memref.load %arg1[%c12] : memref<16xi32, #tpu.memory_space<smem>>
    %85 = arith.index_cast %84 : i32 to index
    %c0_59 = arith.constant 0 : index
    %c0_60 = arith.constant 0 : index
    %86 = vector.load %arg2[%85, %c0_59, %c0_60] : memref<64x1x32xf32, #tpu.memory_space<vmem>>, vector<1x1x32xf32>
    %87 = vector.shape_cast %86 : vector<1x1x32xf32> to vector<1x32xf32>
    %cst_61 = arith.constant 5.65685415 : f32
    %88 = vector.broadcast %cst_61 : f32 to vector<1x32xf32>
    %89 = arith.mulf %87, %88 : vector<1x32xf32>
    %c12_62 = arith.constant 12 : index
    %c0_63 = arith.constant 0 : index
    %90 = vector.load %arg3[%c12_62, %c0_63] : memref<16x32xf32, #tpu.memory_space<vmem>>, vector<1x32xf32>
    tpu.vector_store %arg3[%c12_62, %c0_63], %89 {strides = array<i32>} : memref<16x32xf32, #tpu.memory_space<vmem>>, vector<1x32xf32>,
    %c13 = arith.constant 13 : index
    %91 = memref.load %arg1[%c13] : memref<16xi32, #tpu.memory_space<smem>>
    %92 = arith.index_cast %91 : i32 to index
    %c0_64 = arith.constant 0 : index
    %c0_65 = arith.constant 0 : index
    %93 = vector.load %arg2[%92, %c0_64, %c0_65] : memref<64x1x32xf32, #tpu.memory_space<vmem>>, vector<1x1x32xf32>
    %94 = vector.shape_cast %93 : vector<1x1x32xf32> to vector<1x32xf32>
    %cst_66 = arith.constant 5.65685415 : f32
    %95 = vector.broadcast %cst_66 : f32 to vector<1x32xf32>
    %96 = arith.mulf %94, %95 : vector<1x32xf32>
    %c13_67 = arith.constant 13 : index
    %c0_68 = arith.constant 0 : index
    %97 = vector.load %arg3[%c13_67, %c0_68] : memref<16x32xf32, #tpu.memory_space<vmem>>, vector<1x32xf32>
    tpu.vector_store %arg3[%c13_67, %c0_68], %96 {strides = array<i32>} : memref<16x32xf32, #tpu.memory_space<vmem>>, vector<1x32xf32>,
    %c14 = arith.constant 14 : index
    %98 = memref.load %arg1[%c14] : memref<16xi32, #tpu.memory_space<smem>>
    %99 = arith.index_cast %98 : i32 to index
    %c0_69 = arith.constant 0 : index
    %c0_70 = arith.constant 0 : index
    %100 = vector.load %arg2[%99, %c0_69, %c0_70] : memref<64x1x32xf32, #tpu.memory_space<vmem>>, vector<1x1x32xf32>
    %101 = vector.shape_cast %100 : vector<1x1x32xf32> to vector<1x32xf32>
    %cst_71 = arith.constant 5.65685415 : f32
    %102 = vector.broadcast %cst_71 : f32 to vector<1x32xf32>
    %103 = arith.mulf %101, %102 : vector<1x32xf32>
    %c14_72 = arith.constant 14 : index
    %c0_73 = arith.constant 0 : index
    %104 = vector.load %arg3[%c14_72, %c0_73] : memref<16x32xf32, #tpu.memory_space<vmem>>, vector<1x32xf32>
    tpu.vector_store %arg3[%c14_72, %c0_73], %103 {strides = array<i32>} : memref<16x32xf32, #tpu.memory_space<vmem>>, vector<1x32xf32>,
    %c15 = arith.constant 15 : index
    %105 = memref.load %arg1[%c15] : memref<16xi32, #tpu.memory_space<smem>>
    %106 = arith.index_cast %105 : i32 to index
    %c0_74 = arith.constant 0 : index
    %c0_75 = arith.constant 0 : index
    %107 = vector.load %arg2[%106, %c0_74, %c0_75] : memref<64x1x32xf32, #tpu.memory_space<vmem>>, vector<1x1x32xf32>
    %108 = vector.shape_cast %107 : vector<1x1x32xf32> to vector<1x32xf32>
    %cst_76 = arith.constant 5.65685415 : f32
    %109 = vector.broadcast %cst_76 : f32 to vector<1x32xf32>
    %110 = arith.mulf %108, %109 : vector<1x32xf32>
    %c15_77 = arith.constant 15 : index
    %c0_78 = arith.constant 0 : index
    %111 = vector.load %arg3[%c15_77, %c0_78] : memref<16x32xf32, #tpu.memory_space<vmem>>, vector<1x32xf32>
    tpu.vector_store %arg3[%c15_77, %c0_78], %110 {strides = array<i32>} : memref<16x32xf32, #tpu.memory_space<vmem>>, vector<1x32xf32>,
    return
  }
  func.func @transform_0(%arg0: i32, %arg1: memref<16xi32, #tpu.memory_space<smem>>) -> (i32, i32, i32) {
    %c0_i32 = arith.constant 0 : i32
    %c0_i32_0 = arith.constant 0 : i32
    %c0_i32_1 = arith.constant 0 : i32
    %c0_i32_2 = arith.constant 0 : i32
    return %c0_i32, %c0_i32_0, %c0_i32_1 : i32, i32, i32
  }
  func.func @transform_1(%arg0: i32, %arg1: memref<16xi32, #tpu.memory_space<smem>>) -> (i32, i32) {
    %c0_i32 = arith.constant 0 : i32
    %c0_i32_0 = arith.constant 0 : i32
    %c0_i32_1 = arith.constant 0 : i32
    return %c0_i32, %c0_i32_0 : i32, i32
  }
}

</mosaic_0001>

<bundles_post_ra>
// kernel: embeddings.1
= control target key start
LH: loop header
LB: loop body
LE: loop exit
PB: predicated region body
PF: predicated region fallthrough
CT: control target
= control target key end

     0   :  { %s303_s0 = inlined_call_operand.vmem [shape: s32[16], index: 0, kind: input, shape index: {}]   ;;  %s304_s1 = inlined_call_operand.vmem [shape: f32[64,1,32], index: 1, kind: input, shape index: {}]   ;;  %s305_s2 = inlined_call_operand.hbm [shape: f32[16,32], index: 2, kind: output, shape index: {}]  }
   0x1   :  { %s7_s11 = sshll.u32 %s303_s0, 4  ;;  %s8_s11 = int_to_ptr.vmem [resolvable:$true] %s7_s11 }
   0x2   :  { %s148_s12 = scalar_lea.vmem %s8_s11, 16  ;;  %p153_p1 = scmp.lt.s32.totalorder %s8_s11, %s8_s11 }
   0x3   :  { %p149_p0 = scmp.ne.s32.totalorder %s8_s11, %s148_s12  ;;  %p154_p2 = scmp.lt.s32.totalorder %s148_s12, %s148_s12 }
   0x5   :  { %p155_p3 = por %p154_p2, %p153_p1 }
   0x7   :  { %p156_p4 = pnand %p155_p3, %p149_p0 }
   0x9   :  { %159 = shalt.err (!%p156_p4)  }
   0xa   :  { %s184_s13 = smov [#allocation3]  }
   0xb   :  { %10 = dma.vmem_to_smem %s8_s11, 16, %s184_s13, [#allocation2] }
   0xc   :  { %180 = dma.done.wait [#allocation2], 16 }
   0xd   :  { %181 = vsyncadd [#allocation2], 4294967280 }
   0xe   :  { %12 = sfence }
   0xf   :  { %s16_s14 = sld [smem:[#allocation3]] }
  0x10   :  { %13 = vsyncpa [#allocation5], 0  ;;  %s129_s15 = sld [smem:[#allocation3 + $0x1]]  ;;  %vm20_vm0 = vcmask 253952  }
  0x11   :  { %s130_s16 = sld [smem:[#allocation3 + $0x2]] }
  0x12   :  { %s131_s17 = sld [smem:[#allocation3 + $0x3]] }
  0x13   :  { %s132_s18 = sld [smem:[#allocation3 + $0x4]] }
  0x14   :  { %s133_s0 = sld [smem:[#allocation3 + $0x5]] }
  0x15   :  { %s17_s21 = scalar_lea.vmem %s304_s1, %s16_s14  ;;  %s209_s22 = sld [smem:[#allocation3 + $0x6]] }
  0x16   :  { %v18_v0 = vld [vmem:[%s17_s21] sm:$0x1]  ;;  %s23_s25 = scalar_lea.vmem %s304_s1, %s129_s15  ;;  %s214_s26 = sld [smem:[#allocation3 + $0x7]] }
  0x17   :  { %v19_v1 = vmul.f32 5.656854, %v18_v0  ;;  %v24_v2 = vld [vmem:[%s23_s25] sm:$0x1]  ;;  %s28_s29 = scalar_lea.vmem %s304_s1, %s130_s16  ;;  %s219_s30 = sld [smem:[#allocation3 + $0x8]] }
  0x18   :  { %v25_v3 = vmul.f32 5.656854, %v24_v2  ;;  %v29_v4 = vld [vmem:[%s28_s29] sm:$0x1]  ;;  %s33_s5 = scalar_lea.vmem %s304_s1, %s131_s17  ;;  %s224_s6 = sld [smem:[#allocation3 + $0x9]] }
  0x19   :  { %21 = vst.msk [vmem:[#allocation4] sm:$0x1] %vm20_vm0, %v19_v1  ;;  %v30_v5 = vmul.f32 5.656854, %v29_v4  ;;  %v34_v6 = vld [vmem:[%s33_s5] sm:$0x1]  ;;  %s38_s9 = scalar_lea.vmem %s304_s1, %s132_s18 }
  0x1a   :  { %s230_s10 = sld [smem:[#allocation3 + $0xa]]  ;;  %26 = vst.msk [vmem:[#allocation4 + $0x1] sm:$0x1] %vm20_vm0, %v25_v3  ;;  %v35_v7 = vmul.f32 5.656854, %v34_v6  ;;  %s43_s13 = scalar_lea.vmem %s304_s1, %s133_s0 }
  0x1b   :  { %v39_v8 = vld [vmem:[%s38_s9] sm:$0x1]  ;;  %s236_s14 = sld [smem:[#allocation3 + $0xb]]  ;;  %31 = vst.msk [vmem:[#allocation4 + $0x2] sm:$0x1] %vm20_vm0, %v30_v5  ;;  %s48_s17 = scalar_lea.vmem %s304_s1, %s209_s22 }
  0x1c   :  { %v40_v9 = vmul.f32 5.656854, %v39_v8  ;;  %v44_v10 = vld [vmem:[%s43_s13] sm:$0x1]  ;;  %s243_s18 = sld [smem:[#allocation3 + $0xc]]  ;;  %s53_s0 = scalar_lea.vmem %s304_s1, %s214_s26 }
  0x1d   :  { %36 = vst.msk [vmem:[#allocation4 + $0x3] sm:$0x1] %vm20_vm0, %v35_v7  ;;  %v45_v11 = vmul.f32 5.656854, %v44_v10  ;;  %v49_v12 = vld [vmem:[%s48_s17] sm:$0x1]  ;;  %s58_s24 = scalar_lea.vmem %s304_s1, %s219_s30 }
  0x1e   :  { %s250_s21 = sld [smem:[#allocation3 + $0xd]]  ;;  %41 = vst.msk [vmem:[#allocation4 + $0x4] sm:$0x1] %vm20_vm0, %v40_v9  ;;  %v50_v13 = vmul.f32 5.656854, %v49_v12  ;;  %s63_s28 = scalar_lea.vmem %s304_s1, %s224_s6 }
  0x1f   :  { %v54_v14 = vld [vmem:[%s53_s0] sm:$0x1]  ;;  %s257_s25 = sld [smem:[#allocation3 + $0xe]]  ;;  %46 = vst.msk [vmem:[#allocation4 + $0x5] sm:$0x1] %vm20_vm0, %v45_v11  ;;  %s185_s15 = smov [#allocation4]  }
  0x20   :  { %v55_v15 = vmul.f32 5.656854, %v54_v14  ;;  %v59_v16 = vld [vmem:[%s58_s24] sm:$0x1]  ;;  %s264_s29 = sld [smem:[#allocation3 + $0xf]]  ;;  %s68_s4 = scalar_lea.vmem %s304_s1, %s230_s10 }
  0x21   :  { %51 = vst.msk [vmem:[#allocation4 + $0x6] sm:$0x1] %vm20_vm0, %v50_v13  ;;  %v60_v17 = vmul.f32 5.656854, %v59_v16  ;;  %v64_v18 = vld [vmem:[%s63_s28] sm:$0x1]  ;;  %s73_s6 = scalar_lea.vmem %s304_s1, %s236_s14 }
  0x22   :  { %56 = vst.msk [vmem:[#allocation4 + $0x7] sm:$0x1] %vm20_vm0, %v55_v15  ;;  %v65_v19 = vmul.f32 5.656854, %v64_v18  ;;  %v69_v20 = vld [vmem:[%s68_s4] sm:$0x1]  ;;  %s78_s11 = scalar_lea.vmem %s304_s1, %s243_s18 }
  0x23   :  { %61 = vst.msk [vmem:[#allocation4 + $0x8] sm:$0x1] %vm20_vm0, %v60_v17  ;;  %v70_v21 = vmul.f32 5.656854, %v69_v20  ;;  %v74_v22 = vld [vmem:[%s73_s6] sm:$0x1] }
  0x24   :  { %66 = vst.msk [vmem:[#allocation4 + $0x9] sm:$0x1] %vm20_vm0, %v65_v19  ;;  %v75_v23 = vmul.f32 5.656854, %v74_v22  ;;  %v79_v24 = vld [vmem:[%s78_s11] sm:$0x1]  ;;  %s83_s13 = scalar_lea.vmem %s304_s1, %s250_s21 }
  0x25   :  { %s102_s16 = sshll.u32 %s185_s15, 4  ;;  %71 = vst.msk [vmem:[#allocation4 + $0xa] sm:$0x1] %vm20_vm0, %v70_v21  ;;  %v80_v25 = vmul.f32 5.656854, %v79_v24  ;;  %s88_s19 = scalar_lea.vmem %s304_s1, %s257_s25  ;;  %s103_s16 = int_to_ptr.vmem [resolvable:$true] %s102_s16 }
  0x26   :  { %v84_v26 = vld [vmem:[%s83_s13] sm:$0x1]  ;;  %76 = vst.msk [vmem:[#allocation4 + $0xb] sm:$0x1] %vm20_vm0, %v75_v23  ;;  %s93_s0 = scalar_lea.vmem %s304_s1, %s264_s29  ;;  %s160_s21 = scalar_lea.vmem %s103_s16, 256 }
  0x27   :  { %v85_v27 = vmul.f32 5.656854, %v84_v26  ;;  %v89_v28 = vld [vmem:[%s88_s19] sm:$0x1]  ;;  %81 = vst.msk [vmem:[#allocation4 + $0xc] sm:$0x1] %vm20_vm0, %v80_v25  ;;  %p161_p5 = scmp.ne.s32.totalorder %s103_s16, %s160_s21  ;;  %p165_p6 = scmp.lt.s32.totalorder %s103_s16, %s103_s16 }
  0x28   :  { %v90_v29 = vmul.f32 5.656854, %v89_v28  ;;  %v94_v30 = vld [vmem:[%s93_s0] sm:$0x1]  ;;  %p166_p7 = scmp.lt.s32.totalorder %s160_s21, %s160_s21 }
  0x29   :  { %86 = vst.msk [vmem:[#allocation4 + $0xd] sm:$0x1] %vm20_vm0, %v85_v27  ;;  %v95_v31 = vmul.f32 5.656854, %v94_v30 }
  0x2a   :  { %91 = vst.msk [vmem:[#allocation4 + $0xe] sm:$0x1] %vm20_vm0, %v90_v29  ;;  %p167_p8 = por %p166_p7, %p165_p6 }
  0x2b   :  { %96 = vst.msk [vmem:[#allocation4 + $0xf] sm:$0x1] %vm20_vm0, %v95_v31 }
  0x2c   :  { %p168_p9 = pnand %p167_p8, %p161_p5 }
  0x2e   :  { %171 = shalt.err (!%p168_p9)
}
  0x2f   :  { %s186_s1 = smov 128   ;;  %s187_s23 = smov 8  }
  0x30   :  { %108 = dma.vmem_to_hbm [thread:$0]  %s103_s16, 256, %s305_s2, [#allocation5], %s186_s1, %s186_s1, %s187_s23  }
  0x31   :  { %182 = dma.done.wait [#allocation5], 256  }
  0x32   :  { %183 = vsyncadd [#allocation5], 4294967040 }
  0x33   :  { %112 = vsyncpa [#allocation5], 1 }

</bundles_post_ra>
